<compile_context>
chip_gen: v7x
topology: tpu7x:2x2x1
jax: 0.10.0
libtpu: 0.0.40
codegen_flags: <defaults>
</compile_context>

<pallas_src>
import functools

import jax
import jax.numpy as jnp
from jax.experimental import pallas as pl
from jax.experimental.pallas import tpu as pltpu


# ----------------------------- in-kernel helpers -----------------------------

def _mish_f32(x):
    # x * tanh(softplus(x));  tanh(softplus(x)) = 1 - 2/(t^2 + 2t + 2) with t = e^x.
    # Clamp the exponent so t*t never overflows (the result is exactly 1.0 there anyway).
    t = jnp.exp(jnp.minimum(x, 20.0))
    return x * (1.0 - 2.0 * pl.reciprocal(t * (t + 2.0) + 2.0, approx=True))


def _group_norm(h, gamma, beta, gmat, gmat_t, group_size, eps):
    # h: (BB, T, C) f32; gmat: (C, G) one-hot channel->group; gmat_t: (G, C).
    T = h.shape[1]
    n = float(T * group_size)
    s1 = jnp.sum(h, axis=1)                                                   # (BB, C)
    s2 = jnp.sum(h * h, axis=1)                                               # (BB, C)
    mean_g = jnp.dot(s1, gmat, preferred_element_type=jnp.float32) / n        # (BB, G)
    ex2_g = jnp.dot(s2, gmat, preferred_element_type=jnp.float32) / n         # (BB, G)
    var_g = jnp.maximum(ex2_g - mean_g * mean_g, 0.0)                         # clamp cancellation
    inv_g = jax.lax.rsqrt(var_g + eps)
    mean_c = jnp.dot(mean_g, gmat_t, preferred_element_type=jnp.float32)      # (BB, C)
    inv_c = jnp.dot(inv_g, gmat_t, preferred_element_type=jnp.float32)        # (BB, C)
    return (h - mean_c[:, None, :]) * inv_c[:, None, :] * gamma + beta


# ----------------------------- pallas kernel -----------------------------

def _crb_kernel(xcols_ref, x_ref, scale_ref, bias_ref,
                w1_ref, b1_ref, g1_ref, be1_ref,
                w2_ref, b2_ref, g2_ref, be2_ref,
                *rest,
                BB, T, C_out, K, group_size, eps, has_res_conv):
    if has_res_conv:
        wr_ref, br_ref, gmat_ref, gmatt_ref, out_ref = rest
    else:
        gmat_ref, gmatt_ref, out_ref = rest

    pad = K // 2
    gmat = gmat_ref[...]
    gmat_t = gmatt_ref[...]

    # ---- conv1: all K taps folded into a single matmul (contraction = K*C_in) ----
    lhs1 = xcols_ref[...].reshape(BB * T, -1)                                 # bf16 (BB*T, K*C_in)
    h = jnp.dot(lhs1, w1_ref[...], preferred_element_type=jnp.float32) + b1_ref[...]
    h = h.reshape(BB, T, C_out)
    h = _mish_f32(_group_norm(h, g1_ref[...], be1_ref[...], gmat, gmat_t, group_size, eps))

    # ---- FiLM conditioning (scale / bias precomputed in the wrapper) ----
    h = scale_ref[...][:, None, :] * h + bias_ref[...][:, None, :]

    # ---- conv2: per-tap matmuls; "same" padding via in-register roll + boundary mask ----
    hflat = h.reshape(BB * T, C_out)                                          # f32
    t_loc = jax.lax.broadcasted_iota(jnp.int32, (BB, T, C_out), 1).reshape(BB * T, C_out)
    h2 = jnp.zeros((BB * T, C_out), jnp.float32) + b2_ref[...]
    for k in range(K):
        s = pad - k                                                           # shift toward higher t
        if s == 0:
            lhs = hflat
        else:
            lhs = pltpu.roll(hflat, shift=s % (BB * T), axis=0)
            lhs = jnp.where((t_loc >= s) & (t_loc < T + s), lhs, 0.0)         # zero the wrapped rows
        h2 = h2 + jnp.dot(lhs.astype(jnp.bfloat16), w2_ref[k],
                          preferred_element_type=jnp.float32)
    h2 = h2.reshape(BB, T, C_out)
    h2 = _mish_f32(_group_norm(h2, g2_ref[...], be2_ref[...], gmat, gmat_t, group_size, eps))

    # ---- residual path (1x1 conv, or identity when C_in == C_out) ----
    x = x_ref[...]                                                            # bf16 (BB, T, C_in)
    if has_res_conv:
        res = jnp.dot(x.reshape(BB * T, x.shape[-1]), wr_ref[...],
                      preferred_element_type=jnp.float32).reshape(BB, T, C_out) + br_ref[...]
    else:
        res = x.astype(jnp.float32)

    out_ref[...] = (h2 + res).astype(out_ref.dtype)


# ----------------------------- wrapper -----------------------------

def conditional_residual_block_1d(x_nct, condition, params, *,
                                  kernel_size=3, n_groups=8, eps=1e-5,
                                  block_batch=8):
    """x_nct: (B, C_in, T) f32; condition: (B, cond_dim) f32. Returns (B, C_out, T) f32."""
    B, C_in, T = x_nct.shape
    K = kernel_size
    pad = K // 2

    w1, b1, g1, be1 = params["w1"], params["b1"], params["g1"], params["be1"]
    wc, bc = params["wc"], params["bc"]
    w2, b2, g2, be2 = params["w2"], params["b2"], params["g2"], params["be2"]
    wr, br = params.get("wr"), params.get("br")
    has_res_conv = wr is not None                       # identity residual if C_in == C_out
    C_out = w1.shape[2]
    group_size = C_out // n_groups

    # samples per grid step: largest divisor of B that is <= block_batch
    BB = 1
    for d in range(min(B, block_batch), 0, -1):
        if B % d == 0:
            BB = d
            break

    # ---- wrapper-side glue: layout, conv1 im2col, hoisted FiLM linear ----
    x_ntc = jnp.transpose(x_nct, (0, 2, 1))                                   # (B, T, C_in)
    x_pad = jnp.pad(x_ntc, ((0, 0), (pad, pad), (0, 0)))                      # (B, T+K-1, C_in)
    x_cols = jnp.concatenate([x_pad[:, k:k + T, :] for k in range(K)], axis=-1)  # (B, T, K*C_in)

    def mish(v):
        return v * jnp.tanh(jax.nn.softplus(v))

    ce = mish(condition) @ wc + bc                                            # (B, 2*C_out), one XLA matmul
    scale, bias_f = ce[:, :C_out], ce[:, C_out:]

    # bf16 matmul operands / weights (f32 accumulation inside the kernel)
    x_cols = x_cols.astype(jnp.bfloat16)
    x_bf = x_ntc.astype(jnp.bfloat16)
    w1f = w1.reshape(K * C_in, C_out).astype(jnp.bfloat16)                    # folded conv1 weight
    w2b = w2.astype(jnp.bfloat16)

    # one-hot channel->group matrix for in-kernel GroupNorm statistics
    gmat = (jnp.arange(C_out)[:, None] // group_size
            == jnp.arange(n_groups)[None, :]).astype(jnp.float32)             # (C_out, G)
    gmat_t = gmat.T                                                           # (G, C_out)

    kernel = functools.partial(_crb_kernel, BB=BB, T=T, C_out=C_out, K=K,
                               group_size=group_size, eps=eps,
                               has_res_conv=has_res_conv)

    blk_b3 = lambda b: (b, 0, 0)
    blk_b2 = lambda b: (b, 0)
    full2 = lambda b: (0, 0)
    full3 = lambda b: (0, 0, 0)

    # NOTE(v7x): at production widths, w2 (K*C_out^2) is the VMEM driver; it is already
    # bf16 here. If C_out grows large, add a C_out output-tile grid axis or raise
    # vmem_limit_bytes via pltpu.CompilerParams.
    in_specs = [
        pl.BlockSpec((BB, T, K * C_in), blk_b3),        # conv1 im2col lhs
        pl.BlockSpec((BB, T, C_in), blk_b3),            # raw input (residual path)
        pl.BlockSpec((BB, C_out), blk_b2),              # FiLM scale
        pl.BlockSpec((BB, C_out), blk_b2),              # FiLM bias
        pl.BlockSpec((K * C_in, C_out), full2),         # folded conv1 weight
        pl.BlockSpec((1, C_out), full2),                # conv1 bias
        pl.BlockSpec((1, C_out), full2),                # gn1 gamma
        pl.BlockSpec((1, C_out), full2),                # gn1 beta
        pl.BlockSpec((K, C_out, C_out), full3),         # conv2 weight
        pl.BlockSpec((1, C_out), full2),                # conv2 bias
        pl.BlockSpec((1, C_out), full2),                # gn2 gamma
        pl.BlockSpec((1, C_out), full2),                # gn2 beta
    ]
    args = [x_cols, x_bf, scale, bias_f, w1f, b1, g1, be1, w2b, b2, g2, be2]
    if has_res_conv:
        in_specs += [pl.BlockSpec((C_in, C_out), full2),   # residual 1x1 weight
                     pl.BlockSpec((1, C_out), full2)]      # residual bias
        args += [wr.astype(jnp.bfloat16), br]
    in_specs += [pl.BlockSpec((C_out, n_groups), full2),   # gmat
                 pl.BlockSpec((n_groups, C_out), full2)]   # gmat_t
    args += [gmat, gmat_t]

    # TODO(synk): if production C_out < 128, pack samples along the channel axis for
    # lane-dense (unmasked) output stores; left as-is since the block is generic in C_out.
    out_ntc = pl.pallas_call(
        kernel,
        out_shape=jax.ShapeDtypeStruct((B, T, C_out), jnp.float32),
        grid_spec=pltpu.PrefetchScalarGridSpec(
            num_scalar_prefetch=0,
            grid=(B // BB,),
            in_specs=in_specs,
            out_specs=pl.BlockSpec((BB, T, C_out), blk_b3),
        ),
        # nothing is carried across the batch axis -> legal to shard across TCs (v7x).
        compiler_params=pltpu.CompilerParams(dimension_semantics=("parallel",)),
    )(*args)

    return jnp.transpose(out_ntc, (0, 2, 1))                                  # back to (B, C_out, T)


# ----------------------------- pure-JAX reference -----------------------------

def _reference(x_nct, condition, params, *, kernel_size=3, n_groups=8, eps=1e-5):
    K = kernel_size
    pad = K // 2

    def mish(v):
        return v * jnp.tanh(jax.nn.softplus(v))

    def conv1d(x_ntc, w_kio, b):                                              # w: (K, Cin, Cout)
        T = x_ntc.shape[1]
        xp = jnp.pad(x_ntc, ((0, 0), (pad, pad), (0, 0)))
        out = b[None, None, :]
        for k in range(K):
            out = out + jnp.einsum("btc,co->bto", xp[:, k:k + T, :], w_kio[k])
        return out

    def gn(x_ntc, gamma, beta):
        B, T, C = x_ntc.shape
        g = n_groups
        xg = x_ntc.reshape(B, T, g, C // g)
        mean = xg.mean(axis=(1, 3), keepdims=True)
        var = ((xg - mean) ** 2).mean(axis=(1, 3), keepdims=True)
        xn = ((xg - mean) * jax.lax.rsqrt(var + eps)).reshape(B, T, C)
        return xn * gamma[None, None, :] + beta[None, None, :]

    x = jnp.transpose(x_nct, (0, 2, 1))                                       # (B, T, Cin)
    h = mish(gn(conv1d(x, params["w1"], params["b1"][0]), params["g1"][0], params["be1"][0]))
    ce = mish(condition) @ params["wc"] + params["bc"][0]                     # (B, 2*Cout)
    C_out = params["w1"].shape[2]
    scale, bias = ce[:, None, :C_out], ce[:, None, C_out:]
    h = scale * h + bias
    h = mish(gn(conv1d(h, params["w2"], params["b2"][0]), params["g2"][0], params["be2"][0]))
    if params.get("wr") is not None:
        res = x @ params["wr"] + params["br"][0]
    else:
        res = x
    return jnp.transpose(h + res, (0, 2, 1))


# ----------------------------- main -----------------------------

if __name__ == "__main__":
    B, C_in, T = 2, 4, 16
    C_out, cond_dim = 32, 16
    K, n_groups = 3, 8

    key = jax.random.PRNGKey(0)
    ks = jax.random.split(key, 16)

    params = {
        # conv weights stored as (K, C_in, C_out)  (== PyTorch (C_out, C_in, K) transposed)
        "w1": 0.2 * jax.random.normal(ks[0], (K, C_in, C_out), jnp.float32),
        "b1": 0.1 * jax.random.normal(ks[1], (1, C_out), jnp.float32),
        "g1": 1.0 + 0.1 * jax.random.normal(ks[2], (1, C_out), jnp.float32),
        "be1": 0.1 * jax.random.normal(ks[3], (1, C_out), jnp.float32),
        # cond encoder linear: (cond_dim, 2*C_out)  (== PyTorch weight.T)
        "wc": 0.2 * jax.random.normal(ks[4], (cond_dim, 2 * C_out), jnp.float32),
        "bc": 0.1 * jax.random.normal(ks[5], (1, 2 * C_out), jnp.float32),
        "w2": 0.2 * jax.random.normal(ks[6], (K, C_out, C_out), jnp.float32),
        "b2": 0.1 * jax.random.normal(ks[7], (1, C_out), jnp.float32),
        "g2": 1.0 + 0.1 * jax.random.normal(ks[8], (1, C_out), jnp.float32),
        "be2": 0.1 * jax.random.normal(ks[9], (1, C_out), jnp.float32),
        # residual 1x1 conv (present because in_channels != out_channels here)
        "wr": 0.2 * jax.random.normal(ks[10], (C_in, C_out), jnp.float32),
        "br": 0.1 * jax.random.normal(ks[11], (1, C_out), jnp.float32),
    }

    x = jax.random.normal(ks[12], (B, C_in, T), jnp.float32)
    condition = jax.random.normal(ks[13], (B, cond_dim), jnp.float32)

    out = conditional_residual_block_1d(x, condition, params,
                                        kernel_size=K, n_groups=n_groups)
    out = jax.block_until_ready(out)

    ref = _reference(x, condition, params, kernel_size=K, n_groups=n_groups)
    assert out.shape == (B, C_out, T)
    # tolerance covers bf16 matmul operands + approximate reciprocal in Mish
    assert jnp.allclose(out, ref, atol=3e-2, rtol=3e-2), float(jnp.max(jnp.abs(out - ref)))

    print("KERNEL_OK")
</pallas_src>

<mosaic_0001>
module attributes {stable_mosaic.version = 11 : i64} {
  func.func @_crb_kernel(%arg0: i32, %arg1: memref<2x16x12xbf16, #tpu.memory_space<vmem>>, %arg2: memref<2x16x4xbf16, #tpu.memory_space<vmem>>, %arg3: memref<2x32xf32, #tpu.memory_space<vmem>>, %arg4: memref<2x32xf32, #tpu.memory_space<vmem>>, %arg5: memref<12x32xbf16, #tpu.memory_space<vmem>>, %arg6: memref<1x32xf32, #tpu.memory_space<vmem>>, %arg7: memref<1x32xf32, #tpu.memory_space<vmem>>, %arg8: memref<1x32xf32, #tpu.memory_space<vmem>>, %arg9: memref<3x32x32xbf16, #tpu.memory_space<vmem>>, %arg10: memref<1x32xf32, #tpu.memory_space<vmem>>, %arg11: memref<1x32xf32, #tpu.memory_space<vmem>>, %arg12: memref<1x32xf32, #tpu.memory_space<vmem>>, %arg13: memref<4x32xbf16, #tpu.memory_space<vmem>>, %arg14: memref<1x32xf32, #tpu.memory_space<vmem>>, %arg15: memref<32x8xf32, #tpu.memory_space<vmem>>, %arg16: memref<8x32xf32, #tpu.memory_space<vmem>>, %arg17: memref<2x16x32xf32, #tpu.memory_space<vmem>>) attributes {dimension_semantics = [#tpu.dimension_semantics<parallel>], iteration_bounds = array<i64: 1>, scalar_prefetch = 0 : i64, scratch_operands = 0 : i64, tpu.core_type = #tpu.core_type<tc>, window_params = [{transform_indices = @transform_0, window_bounds = array<i64: 2, 16, 12>}, {transform_indices = @transform_1, window_bounds = array<i64: 2, 16, 4>}, {transform_indices = @transform_2, window_bounds = array<i64: 2, 32>}, {transform_indices = @transform_3, window_bounds = array<i64: 2, 32>}, {pipeline_mode = #tpu.pipeline_mode<synchronous>, transform_indices = @transform_4, window_bounds = array<i64: 12, 32>}, {pipeline_mode = #tpu.pipeline_mode<synchronous>, transform_indices = @transform_5, window_bounds = array<i64: 1, 32>}, {pipeline_mode = #tpu.pipeline_mode<synchronous>, transform_indices = @transform_6, window_bounds = array<i64: 1, 32>}, {pipeline_mode = #tpu.pipeline_mode<synchronous>, transform_indices = @transform_7, window_bounds = array<i64: 1, 32>}, {pipeline_mode = #tpu.pipeline_mode<synchronous>, transform_indices = @transform_8, window_bounds = array<i64: 3, 32, 32>}, {pipeline_mode = #tpu.pipeline_mode<synchronous>, transform_indices = @transform_9, window_bounds = array<i64: 1, 32>}, {pipeline_mode = #tpu.pipeline_mode<synchronous>, transform_indices = @transform_10, window_bounds = array<i64: 1, 32>}, {pipeline_mode = #tpu.pipeline_mode<synchronous>, transform_indices = @transform_11, window_bounds = array<i64: 1, 32>}, {pipeline_mode = #tpu.pipeline_mode<synchronous>, transform_indices = @transform_12, window_bounds = array<i64: 4, 32>}, {pipeline_mode = #tpu.pipeline_mode<synchronous>, transform_indices = @transform_13, window_bounds = array<i64: 1, 32>}, {pipeline_mode = #tpu.pipeline_mode<synchronous>, transform_indices = @transform_14, window_bounds = array<i64: 32, 8>}, {pipeline_mode = #tpu.pipeline_mode<synchronous>, transform_indices = @transform_15, window_bounds = array<i64: 8, 32>}, {transform_indices = @transform_16, window_bounds = array<i64: 2, 16, 32>}]} {
    %c0 = arith.constant 0 : index
    %c0_0 = arith.constant 0 : index
    %0 = vector.load %arg15[%c0, %c0_0] : memref<32x8xf32, #tpu.memory_space<vmem>>, vector<32x8xf32>
    %c0_1 = arith.constant 0 : index
    %c0_2 = arith.constant 0 : index
    %1 = vector.load %arg16[%c0_1, %c0_2] : memref<8x32xf32, #tpu.memory_space<vmem>>, vector<8x32xf32>
    %c0_3 = arith.constant 0 : index
    %c0_4 = arith.constant 0 : index
    %c0_5 = arith.constant 0 : index
    %2 = vector.load %arg1[%c0_3, %c0_4, %c0_5] : memref<2x16x12xbf16, #tpu.memory_space<vmem>>, vector<2x16x12xbf16>
    %3 = vector.shape_cast %2 : vector<2x16x12xbf16> to vector<32x12xbf16>
    %c0_6 = arith.constant 0 : index
    %c0_7 = arith.constant 0 : index
    %4 = vector.load %arg5[%c0_6, %c0_7] : memref<12x32xbf16, #tpu.memory_space<vmem>>, vector<12x32xbf16>
    %cst = arith.constant dense<0.000000e+00> : vector<32x32xf32>
    %5 = tpu.matmul %3, %4, %cst {dimension_numbers = #tpu.dot_dimension_numbers<[1], [0], [0], [1], [0, 0, 1, 1], [], []>} : vector<32x12xbf16>, vector<12x32xbf16>, vector<32x32xf32> -> vector<32x32xf32>
    %c0_8 = arith.constant 0 : index
    %c0_9 = arith.constant 0 : index
    %6 = vector.load %arg6[%c0_8, %c0_9] : memref<1x32xf32, #tpu.memory_space<vmem>>, vector<1x32xf32>
    %7 = vector.broadcast %6 : vector<1x32xf32> to vector<32x32xf32>
    %8 = arith.addf %5, %7 : vector<32x32xf32>
    %9 = vector.shape_cast %8 : vector<32x32xf32> to vector<2x16x32xf32>
    %c0_10 = arith.constant 0 : index
    %c0_11 = arith.constant 0 : index
    %10 = vector.load %arg7[%c0_10, %c0_11] : memref<1x32xf32, #tpu.memory_space<vmem>>, vector<1x32xf32>
    %c0_12 = arith.constant 0 : index
    %c0_13 = arith.constant 0 : index
    %11 = vector.load %arg8[%c0_12, %c0_13] : memref<1x32xf32, #tpu.memory_space<vmem>>, vector<1x32xf32>
    %cst_14 = arith.constant dense<0.000000e+00> : vector<2x32xf32>
    %12 = vector.multi_reduction <add>, %9, %cst_14 [1] : vector<2x16x32xf32> to vector<2x32xf32>
    %13 = arith.mulf %9, %9 : vector<2x16x32xf32>
    %cst_15 = arith.constant dense<0.000000e+00> : vector<2x32xf32>
    %14 = vector.multi_reduction <add>, %13, %cst_15 [1] : vector<2x16x32xf32> to vector<2x32xf32>
    %cst_16 = arith.constant dense<0.000000e+00> : vector<2x8xf32>
    %15 = tpu.matmul %12, %0, %cst_16 {dimension_numbers = #tpu.dot_dimension_numbers<[1], [0], [0], [1], [0, 0, 1, 1], [], []>} : vector<2x32xf32>, vector<32x8xf32>, vector<2x8xf32> -> vector<2x8xf32>
    %cst_17 = arith.constant 6.400000e+01 : f32
    %16 = vector.broadcast %cst_17 : f32 to vector<2x8xf32>
    %17 = arith.divf %15, %16 : vector<2x8xf32>
    %cst_18 = arith.constant dense<0.000000e+00> : vector<2x8xf32>
    %18 = tpu.matmul %14, %0, %cst_18 {dimension_numbers = #tpu.dot_dimension_numbers<[1], [0], [0], [1], [0, 0, 1, 1], [], []>} : vector<2x32xf32>, vector<32x8xf32>, vector<2x8xf32> -> vector<2x8xf32>
    %cst_19 = arith.constant 6.400000e+01 : f32
    %19 = vector.broadcast %cst_19 : f32 to vector<2x8xf32>
    %20 = arith.divf %18, %19 : vector<2x8xf32>
    %21 = arith.mulf %17, %17 : vector<2x8xf32>
    %22 = arith.subf %20, %21 : vector<2x8xf32>
    %cst_20 = arith.constant 0.000000e+00 : f32
    %23 = vector.broadcast %cst_20 : f32 to vector<2x8xf32>
    %24 = arith.maximumf %22, %23 : vector<2x8xf32>
    %cst_21 = arith.constant 9.99999974E-6 : f32
    %25 = vector.broadcast %cst_21 : f32 to vector<2x8xf32>
    %26 = arith.addf %24, %25 : vector<2x8xf32>
    %27 = math.rsqrt %26 : vector<2x8xf32>
    %cst_22 = arith.constant dense<0.000000e+00> : vector<2x32xf32>
    %28 = tpu.matmul %17, %1, %cst_22 {dimension_numbers = #tpu.dot_dimension_numbers<[1], [0], [0], [1], [0, 0, 1, 1], [], []>} : vector<2x8xf32>, vector<8x32xf32>, vector<2x32xf32> -> vector<2x32xf32>
    %cst_23 = arith.constant dense<0.000000e+00> : vector<2x32xf32>
    %29 = tpu.matmul %27, %1, %cst_23 {dimension_numbers = #tpu.dot_dimension_numbers<[1], [0], [0], [1], [0, 0, 1, 1], [], []>} : vector<2x8xf32>, vector<8x32xf32>, vector<2x32xf32> -> vector<2x32xf32>
    %30 = vector.shape_cast %28 : vector<2x32xf32> to vector<2x1x32xf32>
    %31 = vector.broadcast %30 : vector<2x1x32xf32> to vector<2x16x32xf32>
    %32 = arith.subf %9, %31 : vector<2x16x32xf32>
    %33 = vector.shape_cast %29 : vector<2x32xf32> to vector<2x1x32xf32>
    %34 = vector.broadcast %33 : vector<2x1x32xf32> to vector<2x16x32xf32>
    %35 = arith.mulf %32, %34 : vector<2x16x32xf32>
    %36 = vector.shape_cast %10 : vector<1x32xf32> to vector<1x1x32xf32>
    %37 = vector.broadcast %36 : vector<1x1x32xf32> to vector<2x16x32xf32>
    %38 = arith.mulf %35, %37 : vector<2x16x32xf32>
    %39 = vector.shape_cast %11 : vector<1x32xf32> to vector<1x1x32xf32>
    %40 = vector.broadcast %39 : vector<1x1x32xf32> to vector<2x16x32xf32>
    %41 = arith.addf %38, %40 : vector<2x16x32xf32>
    %cst_24 = arith.constant 2.000000e+01 : f32
    %42 = vector.broadcast %cst_24 : f32 to vector<2x16x32xf32>
    %43 = arith.minimumf %41, %42 : vector<2x16x32xf32>
    %44 = math.exp %43 : vector<2x16x32xf32>
    %cst_25 = arith.constant 2.000000e+00 : f32
    %45 = vector.broadcast %cst_25 : f32 to vector<2x16x32xf32>
    %46 = arith.addf %44, %45 : vector<2x16x32xf32>
    %47 = arith.mulf %44, %46 : vector<2x16x32xf32>
    %cst_26 = arith.constant 2.000000e+00 : f32
    %48 = vector.broadcast %cst_26 : f32 to vector<2x16x32xf32>
    %49 = arith.addf %47, %48 : vector<2x16x32xf32>
    %50 = tpu.reciprocal %49 {approx = true} : vector<2x16x32xf32> -> vector<2x16x32xf32>
    %cst_27 = arith.constant 2.000000e+00 : f32
    %51 = vector.broadcast %cst_27 : f32 to vector<2x16x32xf32>
    %52 = arith.mulf %51, %50 : vector<2x16x32xf32>
    %cst_28 = arith.constant 1.000000e+00 : f32
    %53 = vector.broadcast %cst_28 : f32 to vector<2x16x32xf32>
    %54 = arith.subf %53, %52 : vector<2x16x32xf32>
    %55 = arith.mulf %41, %54 : vector<2x16x32xf32>
    %c0_29 = arith.constant 0 : index
    %c0_30 = arith.constant 0 : index
    %56 = vector.load %arg3[%c0_29, %c0_30] : memref<2x32xf32, #tpu.memory_space<vmem>>, vector<2x32xf32>
    %57 = vector.shape_cast %56 : vector<2x32xf32> to vector<2x1x32xf32>
    %58 = vector.broadcast %57 : vector<2x1x32xf32> to vector<2x16x32xf32>
    %59 = arith.mulf %58, %55 : vector<2x16x32xf32>
    %c0_31 = arith.constant 0 : index
    %c0_32 = arith.constant 0 : index
    %60 = vector.load %arg4[%c0_31, %c0_32] : memref<2x32xf32, #tpu.memory_space<vmem>>, vector<2x32xf32>
    %61 = vector.shape_cast %60 : vector<2x32xf32> to vector<2x1x32xf32>
    %62 = vector.broadcast %61 : vector<2x1x32xf32> to vector<2x16x32xf32>
    %63 = arith.addf %59, %62 : vector<2x16x32xf32>
    %64 = vector.shape_cast %63 : vector<2x16x32xf32> to vector<32x32xf32>
    %65 = tpu.iota {dimensions = array<i32: 1>} : vector<2x16x32xi32>
    %66 = vector.shape_cast %65 : vector<2x16x32xi32> to vector<32x32xi32>
    %cst_33 = arith.constant 0.000000e+00 : f32
    %67 = vector.broadcast %cst_33 : f32 to vector<32x32xf32>
    %c0_34 = arith.constant 0 : index
    %c0_35 = arith.constant 0 : index
    %68 = vector.load %arg10[%c0_34, %c0_35] : memref<1x32xf32, #tpu.memory_space<vmem>>, vector<1x32xf32>
    %69 = vector.broadcast %68 : vector<1x32xf32> to vector<32x32xf32>
    %70 = arith.addf %67, %69 : vector<32x32xf32>
    %c1_i32 = arith.constant 1 : i32
    %71 = tpu.dynamic_rotate %64 by %c1_i32 dim 0 : vector<32x32xf32>, i32 -> vector<32x32xf32>
    %c1_i32_36 = arith.constant 1 : i32
    %72 = vector.broadcast %c1_i32_36 : i32 to vector<32x32xi32>
    %73 = arith.cmpi sge, %66, %72 : vector<32x32xi32>
    %c17_i32 = arith.constant 17 : i32
    %74 = vector.broadcast %c17_i32 : i32 to vector<32x32xi32>
    %75 = arith.cmpi slt, %66, %74 : vector<32x32xi32>
    %76 = arith.andi %73, %75 : vector<32x32xi1>
    %cst_37 = arith.constant 0.000000e+00 : f32
    %77 = vector.broadcast %cst_37 : f32 to vector<32x32xf32>
    %78 = arith.select %76, %71, %77 : vector<32x32xi1>, vector<32x32xf32>
    %79 = arith.truncf %78 : vector<32x32xf32> to vector<32x32xbf16>
    %c0_38 = arith.constant 0 : index
    %c0_39 = arith.constant 0 : index
    %c0_40 = arith.constant 0 : index
    %80 = vector.load %arg9[%c0_38, %c0_39, %c0_40] : memref<3x32x32xbf16, #tpu.memory_space<vmem>>, vector<1x32x32xbf16>
    %81 = vector.shape_cast %80 : vector<1x32x32xbf16> to vector<32x32xbf16>
    %cst_41 = arith.constant dense<0.000000e+00> : vector<32x32xf32>
    %82 = tpu.matmul %79, %81, %cst_41 {dimension_numbers = #tpu.dot_dimension_numbers<[1], [0], [0], [1], [0, 0, 1, 1], [], []>} : vector<32x32xbf16>, vector<32x32xbf16>, vector<32x32xf32> -> vector<32x32xf32>
    %83 = arith.addf %70, %82 : vector<32x32xf32>
    %84 = arith.truncf %64 : vector<32x32xf32> to vector<32x32xbf16>
    %c1 = arith.constant 1 : index
    %c0_42 = arith.constant 0 : index
    %c0_43 = arith.constant 0 : index
    %85 = vector.load %arg9[%c1, %c0_42, %c0_43] : memref<3x32x32xbf16, #tpu.memory_space<vmem>>, vector<1x32x32xbf16>
    %86 = vector.shape_cast %85 : vector<1x32x32xbf16> to vector<32x32xbf16>
    %cst_44 = arith.constant dense<0.000000e+00> : vector<32x32xf32>
    %87 = tpu.matmul %84, %86, %cst_44 {dimension_numbers = #tpu.dot_dimension_numbers<[1], [0], [0], [1], [0, 0, 1, 1], [], []>} : vector<32x32xbf16>, vector<32x32xbf16>, vector<32x32xf32> -> vector<32x32xf32>
    %88 = arith.addf %83, %87 : vector<32x32xf32>
    %c31_i32 = arith.constant 31 : i32
    %89 = tpu.dynamic_rotate %64 by %c31_i32 dim 0 : vector<32x32xf32>, i32 -> vector<32x32xf32>
    %c-1_i32 = arith.constant -1 : i32
    %90 = vector.broadcast %c-1_i32 : i32 to vector<32x32xi32>
    %91 = arith.cmpi sge, %66, %90 : vector<32x32xi32>
    %c15_i32 = arith.constant 15 : i32
    %92 = vector.broadcast %c15_i32 : i32 to vector<32x32xi32>
    %93 = arith.cmpi slt, %66, %92 : vector<32x32xi32>
    %94 = arith.andi %91, %93 : vector<32x32xi1>
    %cst_45 = arith.constant 0.000000e+00 : f32
    %95 = vector.broadcast %cst_45 : f32 to vector<32x32xf32>
    %96 = arith.select %94, %89, %95 : vector<32x32xi1>, vector<32x32xf32>
    %97 = arith.truncf %96 : vector<32x32xf32> to vector<32x32xbf16>
    %c2 = arith.constant 2 : index
    %c0_46 = arith.constant 0 : index
    %c0_47 = arith.constant 0 : index
    %98 = vector.load %arg9[%c2, %c0_46, %c0_47] : memref<3x32x32xbf16, #tpu.memory_space<vmem>>, vector<1x32x32xbf16>
    %99 = vector.shape_cast %98 : vector<1x32x32xbf16> to vector<32x32xbf16>
    %cst_48 = arith.constant dense<0.000000e+00> : vector<32x32xf32>
    %100 = tpu.matmul %97, %99, %cst_48 {dimension_numbers = #tpu.dot_dimension_numbers<[1], [0], [0], [1], [0, 0, 1, 1], [], []>} : vector<32x32xbf16>, vector<32x32xbf16>, vector<32x32xf32> -> vector<32x32xf32>
    %101 = arith.addf %88, %100 : vector<32x32xf32>
    %102 = vector.shape_cast %101 : vector<32x32xf32> to vector<2x16x32xf32>
    %c0_49 = arith.constant 0 : index
    %c0_50 = arith.constant 0 : index
    %103 = vector.load %arg11[%c0_49, %c0_50] : memref<1x32xf32, #tpu.memory_space<vmem>>, vector<1x32xf32>
    %c0_51 = arith.constant 0 : index
    %c0_52 = arith.constant 0 : index
    %104 = vector.load %arg12[%c0_51, %c0_52] : memref<1x32xf32, #tpu.memory_space<vmem>>, vector<1x32xf32>
    %cst_53 = arith.constant dense<0.000000e+00> : vector<2x32xf32>
    %105 = vector.multi_reduction <add>, %102, %cst_53 [1] : vector<2x16x32xf32> to vector<2x32xf32>
    %106 = arith.mulf %102, %102 : vector<2x16x32xf32>
    %cst_54 = arith.constant dense<0.000000e+00> : vector<2x32xf32>
    %107 = vector.multi_reduction <add>, %106, %cst_54 [1] : vector<2x16x32xf32> to vector<2x32xf32>
    %cst_55 = arith.constant dense<0.000000e+00> : vector<2x8xf32>
    %108 = tpu.matmul %105, %0, %cst_55 {dimension_numbers = #tpu.dot_dimension_numbers<[1], [0], [0], [1], [0, 0, 1, 1], [], []>} : vector<2x32xf32>, vector<32x8xf32>, vector<2x8xf32> -> vector<2x8xf32>
    %cst_56 = arith.constant 6.400000e+01 : f32
    %109 = vector.broadcast %cst_56 : f32 to vector<2x8xf32>
    %110 = arith.divf %108, %109 : vector<2x8xf32>
    %cst_57 = arith.constant dense<0.000000e+00> : vector<2x8xf32>
    %111 = tpu.matmul %107, %0, %cst_57 {dimension_numbers = #tpu.dot_dimension_numbers<[1], [0], [0], [1], [0, 0, 1, 1], [], []>} : vector<2x32xf32>, vector<32x8xf32>, vector<2x8xf32> -> vector<2x8xf32>
    %cst_58 = arith.constant 6.400000e+01 : f32
    %112 = vector.broadcast %cst_58 : f32 to vector<2x8xf32>
    %113 = arith.divf %111, %112 : vector<2x8xf32>
    %114 = arith.mulf %110, %110 : vector<2x8xf32>
    %115 = arith.subf %113, %114 : vector<2x8xf32>
    %cst_59 = arith.constant 0.000000e+00 : f32
    %116 = vector.broadcast %cst_59 : f32 to vector<2x8xf32>
    %117 = arith.maximumf %115, %116 : vector<2x8xf32>
    %cst_60 = arith.constant 9.99999974E-6 : f32
    %118 = vector.broadcast %cst_60 : f32 to vector<2x8xf32>
    %119 = arith.addf %117, %118 : vector<2x8xf32>
    %120 = math.rsqrt %119 : vector<2x8xf32>
    %cst_61 = arith.constant dense<0.000000e+00> : vector<2x32xf32>
    %121 = tpu.matmul %110, %1, %cst_61 {dimension_numbers = #tpu.dot_dimension_numbers<[1], [0], [0], [1], [0, 0, 1, 1], [], []>} : vector<2x8xf32>, vector<8x32xf32>, vector<2x32xf32> -> vector<2x32xf32>
    %cst_62 = arith.constant dense<0.000000e+00> : vector<2x32xf32>
    %122 = tpu.matmul %120, %1, %cst_62 {dimension_numbers = #tpu.dot_dimension_numbers<[1], [0], [0], [1], [0, 0, 1, 1], [], []>} : vector<2x8xf32>, vector<8x32xf32>, vector<2x32xf32> -> vector<2x32xf32>
    %123 = vector.shape_cast %121 : vector<2x32xf32> to vector<2x1x32xf32>
    %124 = vector.broadcast %123 : vector<2x1x32xf32> to vector<2x16x32xf32>
    %125 = arith.subf %102, %124 : vector<2x16x32xf32>
    %126 = vector.shape_cast %122 : vector<2x32xf32> to vector<2x1x32xf32>
    %127 = vector.broadcast %126 : vector<2x1x32xf32> to vector<2x16x32xf32>
    %128 = arith.mulf %125, %127 : vector<2x16x32xf32>
    %129 = vector.shape_cast %103 : vector<1x32xf32> to vector<1x1x32xf32>
    %130 = vector.broadcast %129 : vector<1x1x32xf32> to vector<2x16x32xf32>
    %131 = arith.mulf %128, %130 : vector<2x16x32xf32>
    %132 = vector.shape_cast %104 : vector<1x32xf32> to vector<1x1x32xf32>
    %133 = vector.broadcast %132 : vector<1x1x32xf32> to vector<2x16x32xf32>
    %134 = arith.addf %131, %133 : vector<2x16x32xf32>
    %cst_63 = arith.constant 2.000000e+01 : f32
    %135 = vector.broadcast %cst_63 : f32 to vector<2x16x32xf32>
    %136 = arith.minimumf %134, %135 : vector<2x16x32xf32>
    %137 = math.exp %136 : vector<2x16x32xf32>
    %cst_64 = arith.constant 2.000000e+00 : f32
    %138 = vector.broadcast %cst_64 : f32 to vector<2x16x32xf32>
    %139 = arith.addf %137, %138 : vector<2x16x32xf32>
    %140 = arith.mulf %137, %139 : vector<2x16x32xf32>
    %cst_65 = arith.constant 2.000000e+00 : f32
    %141 = vector.broadcast %cst_65 : f32 to vector<2x16x32xf32>
    %142 = arith.addf %140, %141 : vector<2x16x32xf32>
    %143 = tpu.reciprocal %142 {approx = true} : vector<2x16x32xf32> -> vector<2x16x32xf32>
    %cst_66 = arith.constant 2.000000e+00 : f32
    %144 = vector.broadcast %cst_66 : f32 to vector<2x16x32xf32>
    %145 = arith.mulf %144, %143 : vector<2x16x32xf32>
    %cst_67 = arith.constant 1.000000e+00 : f32
    %146 = vector.broadcast %cst_67 : f32 to vector<2x16x32xf32>
    %147 = arith.subf %146, %145 : vector<2x16x32xf32>
    %148 = arith.mulf %134, %147 : vector<2x16x32xf32>
    %c0_68 = arith.constant 0 : index
    %c0_69 = arith.constant 0 : index
    %c0_70 = arith.constant 0 : index
    %149 = vector.load %arg2[%c0_68, %c0_69, %c0_70] : memref<2x16x4xbf16, #tpu.memory_space<vmem>>, vector<2x16x4xbf16>
    %150 = vector.shape_cast %149 : vector<2x16x4xbf16> to vector<32x4xbf16>
    %c0_71 = arith.constant 0 : index
    %c0_72 = arith.constant 0 : index
    %151 = vector.load %arg13[%c0_71, %c0_72] : memref<4x32xbf16, #tpu.memory_space<vmem>>, vector<4x32xbf16>
    %cst_73 = arith.constant dense<0.000000e+00> : vector<32x32xf32>
    %152 = tpu.matmul %150, %151, %cst_73 {dimension_numbers = #tpu.dot_dimension_numbers<[1], [0], [0], [1], [0, 0, 1, 1], [], []>} : vector<32x4xbf16>, vector<4x32xbf16>, vector<32x32xf32> -> vector<32x32xf32>
    %153 = vector.shape_cast %152 : vector<32x32xf32> to vector<2x16x32xf32>
    %c0_74 = arith.constant 0 : index
    %c0_75 = arith.constant 0 : index
    %154 = vector.load %arg14[%c0_74, %c0_75] : memref<1x32xf32, #tpu.memory_space<vmem>>, vector<1x32xf32>
    %155 = vector.shape_cast %154 : vector<1x32xf32> to vector<1x1x32xf32>
    %156 = vector.broadcast %155 : vector<1x1x32xf32> to vector<2x16x32xf32>
    %157 = arith.addf %153, %156 : vector<2x16x32xf32>
    %158 = arith.addf %148, %157 : vector<2x16x32xf32>
    %c0_76 = arith.constant 0 : index
    %c0_77 = arith.constant 0 : index
    %c0_78 = arith.constant 0 : index
    %159 = vector.load %arg17[%c0_76, %c0_77, %c0_78] : memref<2x16x32xf32, #tpu.memory_space<vmem>>, vector<2x16x32xf32>
    tpu.vector_store %arg17[%c0_76, %c0_77, %c0_78], %158 {strides = array<i32>} : memref<2x16x32xf32, #tpu.memory_space<vmem>>, vector<2x16x32xf32>,
    return
  }
  func.func @transform_0(%arg0: i32) -> (i32, i32, i32) {
    %c0_i32 = arith.constant 0 : i32
    %c0_i32_0 = arith.constant 0 : i32
    %c0_i32_1 = arith.constant 0 : i32
    return %arg0, %c0_i32, %c0_i32_0 : i32, i32, i32
  }
  func.func @transform_1(%arg0: i32) -> (i32, i32, i32) {
    %c0_i32 = arith.constant 0 : i32
    %c0_i32_0 = arith.constant 0 : i32
    %c0_i32_1 = arith.constant 0 : i32
    return %arg0, %c0_i32, %c0_i32_0 : i32, i32, i32
  }
  func.func @transform_2(%arg0: i32) -> (i32, i32) {
    %c0_i32 = arith.constant 0 : i32
    %c0_i32_0 = arith.constant 0 : i32
    return %arg0, %c0_i32 : i32, i32
  }
  func.func @transform_3(%arg0: i32) -> (i32, i32) {
    %c0_i32 = arith.constant 0 : i32
    %c0_i32_0 = arith.constant 0 : i32
    return %arg0, %c0_i32 : i32, i32
  }
  func.func @transform_4(%arg0: i32) -> (i32, i32) {
    %c0_i32 = arith.constant 0 : i32
    %c0_i32_0 = arith.constant 0 : i32
    %c0_i32_1 = arith.constant 0 : i32
    return %c0_i32, %c0_i32_0 : i32, i32
  }
  func.func @transform_5(%arg0: i32) -> (i32, i32) {
    %c0_i32 = arith.constant 0 : i32
    %c0_i32_0 = arith.constant 0 : i32
    %c0_i32_1 = arith.constant 0 : i32
    return %c0_i32, %c0_i32_0 : i32, i32
  }
  func.func @transform_6(%arg0: i32) -> (i32, i32) {
    %c0_i32 = arith.constant 0 : i32
    %c0_i32_0 = arith.constant 0 : i32
    %c0_i32_1 = arith.constant 0 : i32
    return %c0_i32, %c0_i32_0 : i32, i32
  }
  func.func @transform_7(%arg0: i32) -> (i32, i32) {
    %c0_i32 = arith.constant 0 : i32
    %c0_i32_0 = arith.constant 0 : i32
    %c0_i32_1 = arith.constant 0 : i32
    return %c0_i32, %c0_i32_0 : i32, i32
  }
  func.func @transform_8(%arg0: i32) -> (i32, i32, i32) {
    %c0_i32 = arith.constant 0 : i32
    %c0_i32_0 = arith.constant 0 : i32
    %c0_i32_1 = arith.constant 0 : i32
    %c0_i32_2 = arith.constant 0 : i32
    return %c0_i32, %c0_i32_0, %c0_i32_1 : i32, i32, i32
  }
  func.func @transform_9(%arg0: i32) -> (i32, i32) {
    %c0_i32 = arith.constant 0 : i32
    %c0_i32_0 = arith.constant 0 : i32
    %c0_i32_1 = arith.constant 0 : i32
    return %c0_i32, %c0_i32_0 : i32, i32
  }
  func.func @transform_10(%arg0: i32) -> (i32, i32) {
    %c0_i32 = arith.constant 0 : i32
    %c0_i32_0 = arith.constant 0 : i32
    %c0_i32_1 = arith.constant 0 : i32
    return %c0_i32, %c0_i32_0 : i32, i32
  }
  func.func @transform_11(%arg0: i32) -> (i32, i32) {
    %c0_i32 = arith.constant 0 : i32
    %c0_i32_0 = arith.constant 0 : i32
    %c0_i32_1 = arith.constant 0 : i32
    return %c0_i32, %c0_i32_0 : i32, i32
  }
  func.func @transform_12(%arg0: i32) -> (i32, i32) {
    %c0_i32 = arith.constant 0 : i32
    %c0_i32_0 = arith.constant 0 : i32
    %c0_i32_1 = arith.constant 0 : i32
    return %c0_i32, %c0_i32_0 : i32, i32
  }
  func.func @transform_13(%arg0: i32) -> (i32, i32) {
    %c0_i32 = arith.constant 0 : i32
    %c0_i32_0 = arith.constant 0 : i32
    %c0_i32_1 = arith.constant 0 : i32
    return %c0_i32, %c0_i32_0 : i32, i32
  }
  func.func @transform_14(%arg0: i32) -> (i32, i32) {
    %c0_i32 = arith.constant 0 : i32
    %c0_i32_0 = arith.constant 0 : i32
    %c0_i32_1 = arith.constant 0 : i32
    return %c0_i32, %c0_i32_0 : i32, i32
  }
  func.func @transform_15(%arg0: i32) -> (i32, i32) {
    %c0_i32 = arith.constant 0 : i32
    %c0_i32_0 = arith.constant 0 : i32
    %c0_i32_1 = arith.constant 0 : i32
    return %c0_i32, %c0_i32_0 : i32, i32
  }
  func.func @transform_16(%arg0: i32) -> (i32, i32, i32) {
    %c0_i32 = arith.constant 0 : i32
    %c0_i32_0 = arith.constant 0 : i32
    %c0_i32_1 = arith.constant 0 : i32
    return %arg0, %c0_i32, %c0_i32_0 : i32, i32, i32
  }
}

</mosaic_0001>

<bundles_post_ra>
// kernel: tpu_custom_call.1
= control target key start
LH: loop header
LB: loop body
LE: loop exit
PB: predicated region body
PF: predicated region fallthrough
CT: control target
= control target key end

     0   :  { %s2268_s0 = inlined_call_operand.vmem [shape: bf16[2,16,12], index: 0, kind: input, shape index: {}]   ;;  %s2269_s1 = inlined_call_operand.vmem [shape: bf16[2,16,4], index: 1, kind: input, shape index: {}]   ;;  %s2270_s2 = inlined_call_operand.vmem [shape: f32[2,32], index: 2, kind: input, shape index: {}]   ;;  %s2271_s3 = inlined_call_operand.vmem [shape: f32[2,32], index: 3, kind: input, shape index: {}]   ;;  %s2272_s4 = inlined_call_operand.vmem [shape: bf16[12,32], index: 4, kind: input, shape index: {}]   ;;  %s2273_s5 = inlined_call_operand.vmem [shape: f32[1,32], index: 5, kind: input, shape index: {}]   ;;  %s2274_s6 = inlined_call_operand.vmem [shape: f32[1,32], index: 6, kind: input, shape index: {}]   ;;  %s2275_s7 = inlined_call_operand.vmem [shape: f32[1,32], index: 7, kind: input, shape index: {}]   ;;  %s2276_s8 = inlined_call_operand.vmem [shape: bf16[3,32,32], index: 8, kind: input, shape index: {}]   ;;  %s2277_s9 = inlined_call_operand.vmem [shape: f32[1,32], index: 9, kind: input, shape index: {}]   ;;  %s2278_s10 = inlined_call_operand.vmem [shape: f32[1,32], index: 10, kind: input, shape index: {}]   ;;  %s2279_s11 = inlined_call_operand.vmem [shape: f32[1,32], index: 11, kind: input, shape index: {}]   ;;  %s2280_s12 = inlined_call_operand.vmem [shape: bf16[4,32], index: 12, kind: input, shape index: {}]   ;;  %s2281_s13 = inlined_call_operand.vmem [shape: f32[1,32], index: 13, kind: input, shape index: {}]   ;;  %s2282_s14 = inlined_call_operand.vmem [shape: f32[32,8], index: 14, kind: input, shape index: {}]   ;;  %s2283_s15 = inlined_call_operand.vmem [shape: f32[8,32], index: 15, kind: input, shape index: {}]   ;;  %s2284_s16 = inlined_call_operand.hbm [shape: f32[2,16,32], index: 16, kind: output, shape index: {}]  }
   0x1   :  { %2286 = sst [smem:[#allocation5_spill]] %s2268_s0 }
   0x2   :  { %v1815_v0 = vld [vmem:[%s2272_s4] sm:$0x3f]   ;;  %vm95_vm0 = vcmask 1045504   ;;  %s2287_s25 = sld [smem:[#allocation5_spill]]  ;;  %vm88_vm1 = vcmask 97280  }
   0x3   :  { %1806 = vmatprep.subr.msk.bf16.mxu1 %vm95_vm0, %v1815_v0  ;;  %v97_v2 = vsel %vm95_vm0, %v1815_v0, 0 }
   0x4   :  { %1671 = vmatpush3.bf16.msra.mxu1 %v97_v2 }
   0x8   :  { %v1816_v1 = vld [vmem:[%s2287_s25] sm:$0xff]   ;;  %v1817_v3 = vld [vmem:[%s2287_s25 + $0x8] sm:$0xff]  }
   0x9   :  { %1672 = vmatprep.mubr.msk.bf16.mxu1 %vm88_vm1, %v1816_v1 }
   0xa   :  { %1673 = vmatmul.mubr.msk.bf16.vlgmr.msra.gmra.mrb[0].mxu1 %vm88_vm1, %v1817_v3 }
   0xb   :  { %21 = vsyncpa [#allocation3], 0  ;;  %v55_v4 = vld [vmem:[%s2282_s14] sm:$0xff]  ;;  %v56_v5 = vld [vmem:[%s2282_s14 + $0x8] sm:$0xff]  ;;  %v1886_v7 = vmov 0.0|0.0   ;;  %vm1887_vm2 = vmmov 0  }
   0xc   :  { %v1993_v6 = vpack.c.bf16 %v56_v5, %v55_v4  ;;  %1770 = vmatprep.subr.bf16.mxu1 %v1886_v7  ;;  %1776 = vmatprep.subr.bf16.mxu0 %v1886_v7  ;;  %v57_v8 = vld [vmem:[%s2282_s14 + $0x10] sm:$0xff]  ;;  %v58_v9 = vld [vmem:[%s2282_s14 + $0x18] sm:$0xff]  ;;  %v1888_v11 = vmov 0.0   ;;  %v1578_v12 = vld [vmem:[%s2273_s5] ss:$0 sm:$0xff]  ;;  %vm150_vm3 = vcmask 261120  }
   0xd   :  { %v2007_v10 = vpack.c.bf16 %v58_v9, %v57_v8  ;;  %1684 = vmatprep.mubr.msk.f32.mxu1 %vm1887_vm2, %v1888_v11  ;;  %1695 = vmatprep.mubr.msk.f32.mxu0 %vm1887_vm2, %v1888_v11  ;;  %vm193_vm4 = vcmask 1041409   ;;  %v2059_v63 = vld [vmem:[%s2283_s15] sm:$0xff]  ;;  %vm350_vm5 = vcmask 64512   ;;  %vm1490_vm10 = vcmask 1041408   ;;  %s1890_s26 = smov [#allocation2]  }
   0xe   :  { %1772 = vmatpush3.bf16.msra.mxu1 %v1993_v6  ;;  %1778 = vmatpush3.bf16.msra.mxu0 %v1993_v6  ;;  %vm1483_vm11 = vcmask 31744   ;;  %s1567_s27 = sshll.u32 %s1890_s26, 4  ;;  %s1568_s27 = int_to_ptr.vmem [resolvable:$true] %s1567_s27 }
   0xf   :  { %1773 = vmatprep.subr.bf16.mxu1 %v1886_v7  ;;  %1779 = vmatprep.subr.bf16.mxu0 %v1886_v7  ;;  %p1867_p1 = scmp.lt.s32.totalorder %s1568_s27, %s1568_s27 }
  0x12   :  { %1775 = vmatpush3.bf16.msra.mxu1 %v2007_v10  ;;  %1781 = vmatpush3.bf16.msra.mxu0 %v2007_v10 }
  0x13   :  { %1698 = vmatprep.subr.mxu1 %v1888_v11  ;;  %1703 = vmatprep.subr.mxu0 %v1888_v11 }
  0xdd   :  { %v1674_v13 = vpop.f32.mrb[0].mxu1 }
  0xde   :  { %v2020_v14 = vadd.f32 %v1674_v13, %v1578_v12  ;;  %v133_v15 = vpop.f32.mrb[1].mxu1 }
  0xdf   :  { %v2022_v16 = vadd.f32 %v1578_v12, %v133_v15  ;;  %v1675_v17 = vpop.f32.mrb[2].mxu1 }
  0xe0   :  { %v171_v18 = vmul.f32 %v2020_v14, %v2020_v14  ;;  %v2026_v19 = vadd.f32 %v1675_v17, %v1578_v12  ;;  %v136_v20 = vpop.f32.mrb[3].mxu1  ;;  %v160_v23 = vsel %vm150_vm3, %v2020_v14, 0.0  ;;  %v1818_v17 = vld [vmem:[%s2276_s8] sm:$0xff]  }
  0xe1   :  { %v169_v21 = vmul.f32 %v2022_v16, %v2022_v16  ;;  %v2030_v22 = vadd.f32 %v1578_v12, %v136_v20  ;;  %v151_v26 = vsel %vm150_vm3, %v2022_v16, 0.0  ;;  %v2081_v20 = vld [vmem:[%s2276_s8 + $0x10] sm:$0xff]  }
  0xe2   :  { %v161_v24 = vsel %vm150_vm3, %v2026_v19, 0.0  ;;  %v172_v25 = vmul.f32 %v2026_v19, %v2026_v19  ;;  %v182_v30 = vsel %vm150_vm3, %v171_v18, 0.0  ;;  %v1819_v18 = vld [vmem:[%s2276_s8 + $0x8] sm:$0xff]  }
  0xe3   :  { %v162_v27 = vadd.f32 %v161_v24, %v160_v23  ;;  %v152_v28 = vsel %vm150_vm3, %v2030_v22, 0.0  ;;  %v170_v29 = vmul.f32 %v2030_v22, %v2030_v22  ;;  %v173_v33 = vsel %vm150_vm3, %v169_v21, 0.0 }
  0xe4   :  { %v183_v31 = vsel %vm150_vm3, %v172_v25, 0.0  ;;  %v153_v32 = vadd.f32 %v152_v28, %v151_v26  ;;  %v1889_v21 = vmov 1966171168   ;;  %v501_v24 = vlaneseq }
  0xe5   :  { %v163_v34 = vrot.slane %v162_v27, 4  ;;  %v184_v35 = vadd.f32 %v183_v31, %v182_v30  ;;  %v174_v36 = vsel %vm150_vm3, %v170_v29, 0.0  ;;  %v499_v23 = vunpack.c.l.s4 %v1889_v21 }
  0xe6   :  { %v154_v37 = vrot.slane %v153_v32, 4  ;;  %v175_v38 = vadd.f32 %v174_v36, %v173_v33 }
  0xe7   :  { %v164_v39 = vadd.f32 %v163_v34, %v162_v27  ;;  %v185_v40 = vrot.slane %v184_v35, 4  ;;  %v500_v26 = vunpack.c.0.s8 %v499_v23  ;;  %v2084_v27 = vshrl.u32 %v501_v24, 7 }
  0xe8   :  { %v155_v41 = vadd.f32 %v154_v37, %v153_v32  ;;  %v176_v42 = vrot.slane %v175_v38, 4 }
  0xe9   :  { %v165_v43 = vrot.slane %v164_v39, 2  ;;  %v186_v44 = vadd.f32 %v185_v40, %v184_v35  ;;  %v2087_v29 = vsub.s32 %v500_v26, %v2084_v27  ;;  %v2092_v33 = vsub.s32 0, %v2084_v27 }
  0xea   :  { %v156_v45 = vrot.slane %v155_v41, 2  ;;  %v177_v46 = vadd.f32 %v176_v42, %v175_v38  ;;  %vm722_vm6 = vcmp.lt.s32.totalorder %v2084_v27, 1  ;;  %vm896_vm7 = vcmp.lt.s32.totalorder %v2084_v27, 7 }
  0xeb   :  { %v166_v47 = vadd.f32 %v165_v43, %v164_v39  ;;  %v187_v48 = vrot.slane %v186_v44, 2  ;;  %vm727_vm8 = vcmp.ge.s32.totalorder %v2084_v27, 1 }
  0xec   :  { %v157_v49 = vadd.f32 %v156_v45, %v155_v41  ;;  %v178_v50 = vrot.slane %v177_v46, 2 }
  0xed   :  { %v167_v51 = vrot.slane %v166_v47, 1  ;;  %v188_v52 = vadd.f32 %v187_v48, %v186_v44 }
  0xee   :  { %v158_v53 = vrot.slane %v157_v49, 1  ;;  %v179_v54 = vadd.f32 %v178_v50, %v177_v46 }
  0xef   :  { %v168_v55 = vadd.f32 %v167_v51, %v166_v47  ;;  %v189_v56 = vrot.slane %v188_v52, 1  ;;  %v1588_v47 = vld [vmem:[%s2274_s6] ss:$0 sm:$0xff] }
  0xf0   :  { %v159_v57 = vadd.f32 %v158_v53, %v157_v49  ;;  %v180_v58 = vrot.slane %v179_v54, 1 }
  0xf1   :  { %v190_v59 = vadd.f32 %v189_v56, %v188_v52 }
  0xf2   :  { %v194_v60 = vsel %vm193_vm4, %v168_v55, %v159_v57  ;;  %v181_v61 = vadd.f32 %v180_v58, %v179_v54 }
  0xf3   :  { %1685 = vmatmul.mubr.msk.f32.vlgmr.msra.gmra.mrb[4].mxu1 %vm150_vm3, %v194_v60 }
  0xf4   :  { %v271_v62 = vsel %vm193_vm4, %v190_v59, %v181_v61  ;;  %1700 = vmatprep.mubr.msk.f32.mxu1 %vm1887_vm2, %v1888_v11  ;;  %1699 = vmatpush3.msra.mxu1 %v2059_v63 }
  0xf5   :  { %1696 = vmatmul.mubr.msk.f32.vlgmr.msra.gmra.mrb[0].mxu0 %vm150_vm3, %v271_v62  ;;  %1708 = vmatprep.subr.bf16.mxu1 %v1818_v17 }
  0xf6   :  { %1705 = vmatprep.mubr.msk.f32.mxu0 %vm1887_vm2, %v1888_v11  ;;  %1704 = vmatpush3.msra.mxu0 %v2059_v63 }
  0xf7   :  { %1782 = vmatprep.subr.bf16.mxu0 %v1886_v7 }
 0x1c6   :  { %v263_v0 = vpop.f32.mrb[4].mxu1 }
 0x1c7   :  { %v268_v1 = vmul.f32 0.015625, %v263_v0  ;;  %v1686_v2 = vpop.f32.mrb[5].mxu1 }
 0x1c8   :  { %v340_v3 = vpop.f32.mrb[0].mxu0 }
 0x1c9   :  { %v345_v4 = vmul.f32 %v268_v1, %v268_v1  ;;  %v344_v5 = vmul.f32 0.015625, %v340_v3  ;;  %v1697_v8 = vpop.f32.mrb[1].mxu0  ;;  %1701 = vmatmul.mubr.msk.f32.vlgmr.msra.gmra.mrb[6].mxu1 %vm350_vm5, %v268_v1 }
 0x1ca   :  { %1709 = vmatpush3.bf16.msra.mxu1 %v1818_v17 }
 0x1cb   :  { %v346_v9 = vsub.f32 %v344_v5, %v345_v4  ;;  %1710 = vmatprep.subr.bf16.mxu1 %v1819_v18 }
 0x1cd   :  { %v347_v12 = vmax.f32 %v346_v9, 0.0 }
 0x1ce   :  { %1711 = vmatpush3.bf16.msra.mxu1 %v1819_v18 }
 0x1cf   :  { %v348_v13 = vadd.f32 1e-05, %v347_v12  ;;  %1716 = vmatprep.subr.bf16.mxu1 %v2081_v20 }
 0x1d1   :  { %1826 = vrsqrt.f32 %v348_v13 }
 0x1db   :  { %v1827_v15 = vpop.eup %1826 }
 0x1dc   :  { %1706 = vmatmul.mubr.msk.f32.vlgmr.msra.gmra.mrb[2].mxu0 %vm350_vm5, %v1827_v15 }
 0x1dd   :  { %1784 = vmatpush3.bf16.msra.mxu0 %v1993_v6  ;;  %1740 = vmatprep.mubr.msk.f32.mxu0 %vm1887_vm2, %v1888_v11 }
 0x1de   :  { %1785 = vmatprep.subr.bf16.mxu0 %v1886_v7 }
 0x1e1   :  { %1787 = vmatpush3.bf16.msra.mxu0 %v2007_v10 }
 0x1e2   :  { %1788 = vmatprep.subr.bf16.mxu0 %v1886_v7 }
 0x29c   :  { %v420_v25 = vpop.f32.mrb[6].mxu1 }
 0x29d   :  { %v1702_v28 = vpop.f32.mrb[7].mxu1  ;;  %v504_v30 = vrot.slane %v420_v25, %v2087_v29 }
 0x29f   :  { %v505_v31 = vcombine.high %v504_v30, %v504_v30  ;;  %v512_v32 = vrot.slane %v504_v30, %v2087_v29 }
 0x2a1   :  { %v519_v34 = vrot.slane %v505_v31, %v2087_v29  ;;  %v523_v36 = vrot.slane %v512_v32, %v2092_v33  ;;  %v1590_v31 = vld.sshfl [vmem:[%s2270_s2] sm:$0x11 pattern:$0x75316420] }
 0x2a2   :  { %v1591_v32 = vld.sshfl [vmem:[%s2271_s3] sm:$0x11 pattern:$0x75316420] }
 0x2a3   :  { %v527_v39 = vrot.slane %v519_v34, %v2092_v33  ;;  %v530_v42 = vsub.f32 %v2022_v16, %v523_v36  ;;  %v531_v43 = vsub.f32 %v2030_v22, %v523_v36  ;;  %v1589_v16 = vld [vmem:[%s2275_s7] ss:$0 sm:$0xff]  ;;  %v640_v34 = vcombine.high %v1590_v31, %v1590_v31 }
 0x2a4   :  { %v678_v36 = vcombine.high %v1591_v32, %v1591_v32 }
 0x2a5   :  { %v532_v46 = vsub.f32 %v2020_v14, %v527_v39  ;;  %v533_v48 = vsub.f32 %v2026_v19, %v527_v39 }
 0x2af   :  { %v493_v35 = vpop.f32.mrb[2].mxu0 }
 0x2b0   :  { %v541_v37 = vrot.slane %v493_v35, %v2087_v29  ;;  %v1707_v38 = vpop.f32.mrb[3].mxu0  ;;  %v647_v35 = vrot.slane %v1590_v31, %v2087_v29 }
 0x2b2   :  { %v542_v40 = vcombine.high %v541_v37, %v541_v37  ;;  %v549_v41 = vrot.slane %v541_v37, %v2087_v29 }
 0x2b4   :  { %v556_v44 = vrot.slane %v542_v40, %v2087_v29  ;;  %v560_v45 = vrot.slane %v549_v41, %v2092_v33  ;;  %v654_v40 = vrot.slane %v640_v34, %v2087_v29  ;;  %v685_v41 = vrot.slane %v1591_v32, %v2087_v29 }
 0x2b6   :  { %v564_v49 = vrot.slane %v556_v44, %v2092_v33  ;;  %v567_v50 = vmul.f32 %v560_v45, %v530_v42  ;;  %v568_v51 = vmul.f32 %v560_v45, %v531_v43 }
 0x2b8   :  { %v569_v22 = vmul.f32 %v564_v49, %v532_v46  ;;  %v570_v52 = vmul.f32 %v564_v49, %v533_v48  ;;  %v577_v53 = vmul.f32 %v1588_v47, %v567_v50  ;;  %v578_v54 = vmul.f32 %v1588_v47, %v568_v51 }
 0x2b9   :  { %v692_v48 = vrot.slane %v678_v36, %v2087_v29 }
 0x2ba   :  { %v579_v55 = vmul.f32 %v1588_v47, %v569_v22  ;;  %v580_v14 = vmul.f32 %v1588_v47, %v570_v52  ;;  %v587_v56 = vadd.f32 %v1589_v16, %v577_v53  ;;  %v588_v57 = vadd.f32 %v1589_v16, %v578_v54 }
 0x2bb   :  { %v658_v47 = vrot.slane %v647_v35, %v2092_v33  ;;  %v662_v22 = vrot.slane %v654_v40, %v2092_v33  ;;  %v696_v52 = vrot.slane %v685_v41, %v2092_v33  ;;  %v1823_v41 = vld [vmem:[%s2276_s8 + $0x28] sm:$0xff]  }
 0x2bc   :  { %v589_v58 = vadd.f32 %v1589_v16, %v579_v55  ;;  %v590_v59 = vadd.f32 %v1589_v16, %v580_v14  ;;  %v591_v60 = vmin.f32 %v587_v56, 20.0  ;;  %v592_v19 = vmin.f32 %v588_v57, 20.0 }
 0x2be   :  { %v593_v61 = vmin.f32 %v589_v58, 20.0  ;;  %v594_v62 = vmin.f32 %v590_v59, 20.0  ;;  %v595_v0 = vmul.f32 1.442695, %v591_v60  ;;  %v597_v1 = vmul.f32 1.442695, %v592_v19 }
 0x2bf   :  { %v700_v60 = vrot.slane %v692_v48, %v2092_v33 }
 0x2c0   :  { %1828 = vpow2.f32 %v595_v0  ;;  %v599_v2 = vmul.f32 1.442695, %v593_v61  ;;  %v601_v3 = vmul.f32 1.442695, %v594_v62 }
 0x2c1   :  { %1830 = vpow2.f32 %v597_v1  ;;  %v709_v1 = vadd.s32 8, %v2084_v27  ;;  %v1822_v27 = vld [vmem:[%s2276_s8 + $0x20] sm:$0xff]  }
 0x2c2   :  { %1832 = vpow2.f32 %v599_v2 }
 0x2c3   :  { %1834 = vpow2.f32 %v601_v3  ;;  %vm904_vm9 = vcmp.lt.s32.totalorder %v709_v1, 15 }
 0x2ca   :  { %v1829_v4 = vpop.eup %1828 }
 0x2cb   :  { %v1831_v5 = vpop.eup %1830  ;;  %v603_v8 = vadd.f32 2.0, %v1829_v4 }
 0x2cc   :  { %v1833_v9 = vpop.eup %1832  ;;  %v604_v12 = vadd.f32 2.0, %v1831_v5 }
 0x2cd   :  { %v1835_v13 = vpop.eup %1834  ;;  %v605_v15 = vadd.f32 2.0, %v1833_v9  ;;  %v607_v17 = vmul.f32 %v1829_v4, %v603_v8 }
 0x2ce   :  { %v606_v18 = vadd.f32 2.0, %v1835_v13  ;;  %v608_v21 = vmul.f32 %v1831_v5, %v604_v12 }
 0x2cf   :  { %v609_v23 = vmul.f32 %v1833_v9, %v605_v15  ;;  %v611_v24 = vadd.f32 2.0, %v607_v17 }
 0x2d0   :  { %v610_v25 = vmul.f32 %v1835_v13, %v606_v18  ;;  %v612_v26 = vadd.f32 2.0, %v608_v21 }
 0x2d1   :  { %v613_v28 = vadd.f32 2.0, %v609_v23  ;;  %1836 = vrcp.f32 %v611_v24 }
 0x2d2   :  { %v614_v30 = vadd.f32 2.0, %v610_v25  ;;  %1838 = vrcp.f32 %v612_v26 }
 0x2d3   :  { %1840 = vrcp.f32 %v613_v28 }
 0x2d4   :  { %1842 = vrcp.f32 %v614_v30 }
 0x2db   :  { %v1837_v37 = vpop.eup %1836 }
 0x2dc   :  { %v1839_v38 = vpop.eup %1838  ;;  %v619_v39 = vmul.f32 2.0, %v1837_v37 }
 0x2dd   :  { %v1841_v42 = vpop.eup %1840  ;;  %v620_v43 = vmul.f32 2.0, %v1839_v38 }
 0x2de   :  { %v1843_v44 = vpop.eup %1842  ;;  %v621_v45 = vmul.f32 2.0, %v1841_v42  ;;  %v623_v46 = vsub.f32 1.0, %v619_v39  ;;  %v1821_v39 = vld [vmem:[%s2276_s8 + $0x18] sm:$0xff]  }
 0x2df   :  { %v622_v49 = vmul.f32 2.0, %v1843_v44  ;;  %v624_v50 = vsub.f32 1.0, %v620_v43 }
 0x2e0   :  { %v625_v51 = vsub.f32 1.0, %v621_v45  ;;  %v627_v16 = vmul.f32 %v623_v46, %v587_v56 }
 0x2e1   :  { %v626_v53 = vsub.f32 1.0, %v622_v49  ;;  %v628_v54 = vmul.f32 %v624_v50, %v588_v57 }
 0x2e2   :  { %v629_v55 = vmul.f32 %v625_v51, %v589_v58  ;;  %v665_v14 = vmul.f32 %v658_v47, %v627_v16 }
 0x2e3   :  { %v630_v19 = vmul.f32 %v626_v53, %v590_v59  ;;  %v666_v61 = vmul.f32 %v658_v47, %v628_v54 }
 0x2e4   :  { %v667_v62 = vmul.f32 %v662_v22, %v629_v55  ;;  %v703_v0 = vadd.f32 %v696_v52, %v665_v14 }
 0x2e5   :  { %v668_v2 = vmul.f32 %v662_v22, %v630_v19  ;;  %v704_v3 = vadd.f32 %v696_v52, %v666_v61 }
 0x2e6   :  { %v705_v56 = vadd.f32 %v700_v60, %v667_v62  ;;  %v718_v4 = vrot.slane %v703_v0, 7  ;;  %v892_v5 = vrot.slane %v703_v0, 1 }
 0x2e7   :  { %v706_v57 = vadd.f32 %v700_v60, %v668_v2  ;;  %v719_v58 = vrot.slane %v704_v3, 7  ;;  %v814_v8 = vpack.c.bf16 %v704_v3, %v703_v0  ;;  %v893_v9 = vrot.slane %v704_v3, 1 }
 0x2e8   :  { %v720_v12 = vrot.slane %v705_v56, 7  ;;  %v894_v59 = vrot.slane %v705_v56, 1 }
 0x2e9   :  { %v721_v13 = vrot.slane %v706_v57, 7  ;;  %v725_v15 = vsel %vm722_vm6, %v718_v4, %v719_v58  ;;  %v815_v17 = vpack.c.bf16 %v706_v57, %v705_v56  ;;  %v895_v18 = vrot.slane %v706_v57, 1 }
 0x2ea   :  { %v724_v21 = vsel %vm722_vm6, %v719_v58, %v720_v12  ;;  %v898_v23 = vsel %vm896_vm7, %v893_v9, %v894_v59  ;;  %v899_v24 = vsel %vm896_vm7, %v892_v5, %v893_v9 }
 0x2eb   :  { %v723_v25 = vsel %vm722_vm6, %v720_v12, %v721_v13  ;;  %v726_v26 = vsel %vm722_vm6, %v721_v13, %v718_v4  ;;  %v735_v28 = vsel %vm727_vm8, %v724_v21, 0.0  ;;  %v897_v30 = vsel %vm896_vm7, %v894_v59, %v895_v18 }
 0x2ec   :  { %v733_v31 = vsel %vm727_vm8, %v726_v26, 0.0  ;;  %v738_v32 = vpack.c.bf16 %v723_v25, %v735_v28  ;;  %v900_v34 = vsel %vm896_vm7, %v895_v18, %v892_v5  ;;  %v908_v35 = vsel %vm904_vm9, %v898_v23, 0.0 }
 0x2ed   :  { %v737_v36 = vpack.c.bf16 %v725_v15, %v733_v31  ;;  %v910_v37 = vsel %vm904_vm9, %v900_v34, 0.0  ;;  %v911_v38 = vpack.c.bf16 %v908_v35, %v899_v24 }
 0x2ee   :  { %v912_v40 = vpack.c.bf16 %v910_v37, %v897_v30 }
 0x2ef   :  { %1712 = vmatprep.mubr.msk.bf16.mxu1 %vm150_vm3, %v737_v36 }
 0x2f0   :  { %1713 = vmatmul.mubr.msk.bf16.vlgmr.msra.gmra.mrb[8].mxu1 %vm150_vm3, %v738_v32 }
 0x2f1   :  { %1717 = vmatpush3.bf16.msra.mxu1 %v2081_v20  ;;  %1720 = vmatprep.mubr.msk.bf16.mxu1 %vm150_vm3, %v814_v8  ;;  %v1592_v20 = vld [vmem:[%s2277_s9] ss:$0 sm:$0xff] }
 0x2f2   :  { %1718 = vmatprep.subr.bf16.mxu1 %v1821_v39 }
 0x2f5   :  { %1719 = vmatpush3.bf16.msra.mxu1 %v1821_v39 }
 0x2f6   :  { %1724 = vmatprep.subr.bf16.mxu1 %v1822_v27 }
 0x2fc   :  { %1721 = vmatmul.mubr.msk.bf16.vlgmr.msra.gmra.mrb[8].mxu1 %vm150_vm3, %v815_v17 }
 0x2fd   :  { %1725 = vmatpush3.bf16.msra.mxu1 %v1822_v27  ;;  %1728 = vmatprep.mubr.msk.bf16.mxu1 %vm150_vm3, %v911_v38 }
 0x2fe   :  { %1726 = vmatprep.subr.bf16.mxu1 %v1823_v41 }
 0x301   :  { %1727 = vmatpush3.bf16.msra.mxu1 %v1823_v41 }
 0x308   :  { %1729 = vmatmul.mubr.msk.bf16.vlgmr.msra.gmra.mrb[8].mxu1 %vm150_vm3, %v912_v40 }
 0x3db   :  { %v1730_v42 = vpop.f32.mrb[8].mxu1 }
 0x3dc   :  { %v2167_v43 = vadd.f32 %v1730_v42, %v1592_v20  ;;  %v970_v44 = vpop.f32.mrb[9].mxu1 }
 0x3dd   :  { %v2169_v45 = vadd.f32 %v1592_v20, %v970_v44  ;;  %v1731_v46 = vpop.f32.mrb[10].mxu1  ;;  %v1824_v44 = vld [vmem:[%s2269_s1] sm:$0xff]  }
 0x3de   :  { %v1011_v47 = vmul.f32 %v2167_v43, %v2167_v43  ;;  %v2173_v48 = vadd.f32 %v1731_v46, %v1592_v20  ;;  %v973_v49 = vpop.f32.mrb[11].mxu1  ;;  %v1000_v16 = vsel %vm150_vm3, %v2167_v43, 0.0 }
 0x3df   :  { %v1009_v50 = vmul.f32 %v2169_v45, %v2169_v45  ;;  %v2177_v51 = vadd.f32 %v1592_v20, %v973_v49  ;;  %v991_v53 = vsel %vm150_vm3, %v2169_v45, 0.0 }
 0x3e0   :  { %v1001_v22 = vsel %vm150_vm3, %v2173_v48, 0.0  ;;  %v1012_v52 = vmul.f32 %v2173_v48, %v2173_v48  ;;  %v1022_v60 = vsel %vm150_vm3, %v1011_v47, 0.0 }
 0x3e1   :  { %v1002_v54 = vadd.f32 %v1001_v22, %v1000_v16  ;;  %v992_v55 = vsel %vm150_vm3, %v2177_v51, 0.0  ;;  %v1010_v14 = vmul.f32 %v2177_v51, %v2177_v51  ;;  %v1013_v62 = vsel %vm150_vm3, %v1009_v50, 0.0 }
 0x3e2   :  { %v1023_v19 = vsel %vm150_vm3, %v1012_v52, 0.0  ;;  %v993_v61 = vadd.f32 %v992_v55, %v991_v53 }
 0x3e3   :  { %v1003_v0 = vrot.slane %v1002_v54, 4  ;;  %v1024_v1 = vadd.f32 %v1023_v19, %v1022_v60  ;;  %v1014_v2 = vsel %vm150_vm3, %v1010_v14, 0.0 }
 0x3e4   :  { %v994_v3 = vrot.slane %v993_v61, 4  ;;  %v1015_v56 = vadd.f32 %v1014_v2, %v1013_v62 }
 0x3e5   :  { %v1004_v4 = vadd.f32 %v1003_v0, %v1002_v54  ;;  %v1025_v5 = vrot.slane %v1024_v1, 4 }
 0x3e6   :  { %v995_v57 = vadd.f32 %v994_v3, %v993_v61  ;;  %v1016_v58 = vrot.slane %v1015_v56, 4 }
 0x3e7   :  { %v1005_v8 = vrot.slane %v1004_v4, 2  ;;  %v1026_v9 = vadd.f32 %v1025_v5, %v1024_v1  ;;  %v1617_v5 = vld [vmem:[%s2278_s10] ss:$0 sm:$0xff] }
 0x3e8   :  { %v996_v12 = vrot.slane %v995_v57, 2  ;;  %v1017_v59 = vadd.f32 %v1016_v58, %v1015_v56 }
 0x3e9   :  { %v1006_v13 = vadd.f32 %v1005_v8, %v1004_v4  ;;  %v1027_v15 = vrot.slane %v1026_v9, 2 }
 0x3ea   :  { %v997_v17 = vadd.f32 %v996_v12, %v995_v57  ;;  %v1018_v18 = vrot.slane %v1017_v59, 2 }
 0x3eb   :  { %v1007_v21 = vrot.slane %v1006_v13, 1  ;;  %v1028_v23 = vadd.f32 %v1027_v15, %v1026_v9 }
 0x3ec   :  { %v998_v24 = vrot.slane %v997_v17, 1  ;;  %v1019_v25 = vadd.f32 %v1018_v18, %v1017_v59 }
 0x3ed   :  { %v1008_v26 = vadd.f32 %v1007_v21, %v1006_v13  ;;  %v1029_v32 = vrot.slane %v1028_v23, 1 }
 0x3ee   :  { %v999_v28 = vadd.f32 %v998_v24, %v997_v17  ;;  %v1020_v31 = vrot.slane %v1019_v25, 1 }
 0x3ef   :  { %v1030_v35 = vadd.f32 %v1029_v32, %v1028_v23 }
 0x3f0   :  { %v1033_v30 = vsel %vm193_vm4, %v1008_v26, %v999_v28  ;;  %v1021_v34 = vadd.f32 %v1020_v31, %v1019_v25 }
 0x3f1   :  { %1741 = vmatmul.mubr.msk.f32.vlgmr.msra.gmra.mrb[4].mxu0 %vm150_vm3, %v1033_v30 }
 0x3f2   :  { %1790 = vmatpush3.bf16.msra.mxu0 %v1993_v6  ;;  %1751 = vmatprep.mubr.msk.f32.mxu0 %vm1887_vm2, %v1888_v11  ;;  %v1109_v36 = vsel %vm193_vm4, %v1030_v35, %v1021_v34 }
 0x3f3   :  { %1791 = vmatprep.subr.bf16.mxu0 %v1886_v7 }
 0x3f6   :  { %1793 = vmatpush3.bf16.msra.mxu0 %v2007_v10  ;;  %v1472_v10 = vld [vmem:[%s2280_s12] sm:$0x3] }
 0x3f7   :  { %1754 = vmatprep.subr.mxu0 %v1888_v11  ;;  %v1492_v46 = vsel %vm1490_vm10, %v1472_v10, 0 }
 0x3f9   :  { %1752 = vmatmul.mubr.msk.f32.vlgmr.msra.gmra.mrb[6].mxu0 %vm150_vm3, %v1109_v36 }
 0x3fa   :  { %1755 = vmatpush3.msra.mxu0 %v2059_v63  ;;  %1756 = vmatprep.mubr.msk.f32.mxu0 %vm1887_vm2, %v1888_v11 }
 0x3fb   :  { %1759 = vmatprep.subr.mxu0 %v1888_v11 }
 0x4c4   :  { %v1102_v6 = vpop.f32.mrb[4].mxu0 }
 0x4c5   :  { %v1106_v37 = vmul.f32 0.015625, %v1102_v6  ;;  %v1742_v7 = vpop.f32.mrb[5].mxu0 }
 0x4c7   :  { %1757 = vmatmul.mubr.msk.f32.vlgmr.msra.gmra.mrb[8].mxu0 %vm350_vm5, %v1106_v37  ;;  %v1183_v39 = vmul.f32 %v1106_v37, %v1106_v37 }
 0x4c8   :  { %1760 = vmatpush3.msra.mxu0 %v2059_v63  ;;  %1761 = vmatprep.mubr.msk.f32.mxu0 %vm1887_vm2, %v1888_v11  ;;  %v1825_v11 = vld [vmem:[%s2269_s1 + $0x8] sm:$0xff]  }
 0x4c9   :  { %1807 = vmatprep.subr.msk.bf16.mxu0 %vm1490_vm10, %v1472_v10 }
 0x4cc   :  { %v1178_v38 = vpop.f32.mrb[6].mxu0 }
 0x4cd   :  { %v1182_v40 = vmul.f32 0.015625, %v1178_v38  ;;  %v1753_v27 = vpop.f32.mrb[7].mxu0 }
 0x4cf   :  { %v1184_v41 = vsub.f32 %v1182_v40, %v1183_v39 }
 0x4d1   :  { %v1185_v20 = vmax.f32 %v1184_v41, 0.0 }
 0x4d3   :  { %v1186_v42 = vadd.f32 1e-05, %v1185_v20 }
 0x4d5   :  { %1844 = vrsqrt.f32 %v1186_v42 }
 0x4df   :  { %v1845_v47 = vpop.eup %1844 }
 0x4e0   :  { %1762 = vmatmul.mubr.msk.f32.vlgmr.msra.gmra.mrb[10].mxu0 %vm350_vm5, %v1845_v47 }
 0x4e1   :  { %1765 = vmatpush3.bf16.msra.mxu0 %v1492_v46  ;;  %1766 = vmatprep.mubr.msk.bf16.mxu0 %vm1483_vm11, %v1824_v44 }
 0x4e4   :  { %1767 = vmatmul.mubr.msk.bf16.vlgmr.msra.gmra.mrb[12].mxu0 %vm1483_vm11, %v1825_v11  ;;  %v1623_v11 = vld [vmem:[%s2281_s13] ss:$0 sm:$0xff]  ;;  %s1862_s13 = scalar_lea.vmem %s1568_s27, 512 }
 0x4e5   :  { %p1863_p0 = scmp.ne.s32.totalorder %s1568_s27, %s1862_s13  ;;  %p1868_p2 = scmp.lt.s32.totalorder %s1862_s13, %s1862_s13 }
 0x4e7   :  { %p1869_p3 = por %p1868_p2, %p1867_p1 }
 0x4e9   :  { %p1870_p4 = pnand %p1869_p3, %p1863_p0 }
 0x59a   :  { %v1257_v63 = vpop.f32.mrb[8].mxu0 }
 0x59b   :  { %v1758_v49 = vpop.f32.mrb[9].mxu0  ;;  %v1341_v50 = vrot.slane %v1257_v63, %v2087_v29 }
 0x59d   :  { %v1342_v16 = vcombine.high %v1341_v50, %v1341_v50  ;;  %v1349_v22 = vrot.slane %v1341_v50, %v2087_v29 }
 0x59f   :  { %v1356_v52 = vrot.slane %v1342_v16, %v2087_v29  ;;  %v1360_v54 = vrot.slane %v1349_v22, %v2092_v33 }
 0x5a1   :  { %v1364_v60 = vrot.slane %v1356_v52, %v2092_v33  ;;  %v1367_v0 = vsub.f32 %v2169_v45, %v1360_v54  ;;  %v1368_v1 = vsub.f32 %v2177_v51, %v1360_v54 }
 0x5a3   :  { %v1369_v4 = vsub.f32 %v2167_v43, %v1364_v60  ;;  %v1370_v58 = vsub.f32 %v2173_v48, %v1364_v60 }
 0x5b3   :  { %v1330_v53 = vpop.f32.mrb[10].mxu0 }
 0x5b4   :  { %v1378_v55 = vrot.slane %v1330_v53, %v2087_v29  ;;  %v1763_v14 = vpop.f32.mrb[11].mxu0 }
 0x5b6   :  { %v1379_v19 = vcombine.high %v1378_v55, %v1378_v55  ;;  %v1386_v61 = vrot.slane %v1378_v55, %v2087_v29 }
 0x5b7   :  { %v2230_v62 = vpop.f32.mrb[12].mxu0 }
 0x5b8   :  { %v1393_v2 = vrot.slane %v1379_v19, %v2087_v29  ;;  %v1397_v3 = vrot.slane %v1386_v61, %v2092_v33  ;;  %v1528_v56 = vpop.f32.mrb[13].mxu0  ;;  %v1618_v29 = vld [vmem:[%s2279_s11] ss:$0 sm:$0xff] }
 0x5b9   :  { %v2240_v57 = vpop.f32.mrb[14].mxu0  ;;  %v1550_v54 = vadd.f32 %v1623_v11, %v1528_v56 }
 0x5ba   :  { %v1401_v8 = vrot.slane %v1393_v2, %v2092_v33  ;;  %v1404_v45 = vmul.f32 %v1397_v3, %v1367_v0  ;;  %v1405_v9 = vmul.f32 %v1397_v3, %v1368_v1  ;;  %v1531_v51 = vpop.f32.mrb[15].mxu0  ;;  %v1552_v3 = vadd.f32 %v2230_v62, %v1623_v11 }
 0x5bb   :  { %v1551_v60 = vadd.f32 %v1623_v11, %v1531_v51 }
 0x5bc   :  { %v1406_v12 = vmul.f32 %v1401_v8, %v1369_v4  ;;  %v1407_v59 = vmul.f32 %v1401_v8, %v1370_v58  ;;  %v1414_v43 = vmul.f32 %v1617_v5, %v1404_v45  ;;  %v1415_v13 = vmul.f32 %v1617_v5, %v1405_v9 }
 0x5bd   :  { %v1553_v58 = vadd.f32 %v2240_v57, %v1623_v11 }
 0x5be   :  { %v1416_v15 = vmul.f32 %v1617_v5, %v1406_v12  ;;  %v1424_v17 = vadd.f32 %v1618_v29, %v1414_v43  ;;  %v1417_v18 = vmul.f32 %v1617_v5, %v1407_v59  ;;  %v1425_v21 = vadd.f32 %v1618_v29, %v1415_v13 }
 0x5c0   :  { %v1426_v23 = vadd.f32 %v1618_v29, %v1416_v15  ;;  %v1428_v24 = vmin.f32 %v1424_v17, 20.0  ;;  %v1427_v48 = vadd.f32 %v1618_v29, %v1417_v18  ;;  %v1429_v25 = vmin.f32 %v1425_v21, 20.0 }
 0x5c2   :  { %v1430_v33 = vmin.f32 %v1426_v23, 20.0  ;;  %v1432_v26 = vmul.f32 1.442695, %v1428_v24  ;;  %v1431_v28 = vmin.f32 %v1427_v48, 20.0  ;;  %v1434_v30 = vmul.f32 1.442695, %v1429_v25 }
 0x5c4   :  { %v1436_v31 = vmul.f32 1.442695, %v1430_v33  ;;  %1846 = vpow2.f32 %v1432_v26  ;;  %v1438_v32 = vmul.f32 1.442695, %v1431_v28 }
 0x5c5   :  { %1848 = vpow2.f32 %v1434_v30 }
 0x5c6   :  { %1850 = vpow2.f32 %v1436_v31 }
 0x5c7   :  { %1852 = vpow2.f32 %v1438_v32 }
 0x5ce   :  { %v1847_v34 = vpop.eup %1846 }
 0x5cf   :  { %v1849_v35 = vpop.eup %1848  ;;  %v1440_v36 = vadd.f32 2.0, %v1847_v34 }
 0x5d0   :  { %v1851_v6 = vpop.eup %1850  ;;  %v1441_v37 = vadd.f32 2.0, %v1849_v35 }
 0x5d1   :  { %v1853_v7 = vpop.eup %1852  ;;  %v1442_v10 = vadd.f32 2.0, %v1851_v6  ;;  %v1444_v38 = vmul.f32 %v1847_v34, %v1440_v36 }
 0x5d2   :  { %v1443_v39 = vadd.f32 2.0, %v1853_v7  ;;  %v1445_v40 = vmul.f32 %v1849_v35, %v1441_v37 }
 0x5d3   :  { %v1446_v27 = vmul.f32 %v1851_v6, %v1442_v10  ;;  %v1448_v41 = vadd.f32 2.0, %v1444_v38 }
 0x5d4   :  { %v1447_v20 = vmul.f32 %v1853_v7, %v1443_v39  ;;  %v1449_v42 = vadd.f32 2.0, %v1445_v40 }
 0x5d5   :  { %v1450_v44 = vadd.f32 2.0, %v1446_v27  ;;  %1854 = vrcp.f32 %v1448_v41 }
 0x5d6   :  { %v1451_v46 = vadd.f32 2.0, %v1447_v20  ;;  %1856 = vrcp.f32 %v1449_v42 }
 0x5d7   :  { %1858 = vrcp.f32 %v1450_v44 }
 0x5d8   :  { %1860 = vrcp.f32 %v1451_v46 }
 0x5df   :  { %v1855_v47 = vpop.eup %1854 }
 0x5e0   :  { %v1857_v63 = vpop.eup %1856  ;;  %v1456_v49 = vmul.f32 2.0, %v1855_v47 }
 0x5e1   :  { %v1859_v50 = vpop.eup %1858  ;;  %v1457_v16 = vmul.f32 2.0, %v1857_v63 }
 0x5e2   :  { %v1861_v22 = vpop.eup %1860  ;;  %v1458_v52 = vmul.f32 2.0, %v1859_v50  ;;  %v1460_v53 = vsub.f32 1.0, %v1456_v49 }
 0x5e3   :  { %v1459_v55 = vmul.f32 2.0, %v1861_v22  ;;  %v1461_v14 = vsub.f32 1.0, %v1457_v16 }
 0x5e4   :  { %v1462_v19 = vsub.f32 1.0, %v1458_v52  ;;  %v1464_v61 = vmul.f32 %v1460_v53, %v1424_v17 }
 0x5e5   :  { %v1463_v0 = vsub.f32 1.0, %v1459_v55  ;;  %v1465_v1 = vmul.f32 %v1461_v14, %v1425_v21 }
 0x5e6   :  { %v1466_v2 = vmul.f32 %v1462_v19, %v1426_v23  ;;  %v1554_v4 = vadd.f32 %v1550_v54, %v1464_v61 }
 0x5e7   :  { %v1467_v5 = vmul.f32 %v1463_v0, %v1427_v48  ;;  %v1555_v8 = vadd.f32 %v1551_v60, %v1465_v1 }
 0x5e8   :  { %v1556_v45 = vadd.f32 %v1552_v3, %v1466_v2  ;;  %1558 = vst.msk [vmem:[#allocation2] sm:$0xff] %vm150_vm3, %v1554_v4 }
 0x5e9   :  { %v1557_v56 = vadd.f32 %v1553_v58, %v1467_v5  ;;  %1559 = vst.msk [vmem:[#allocation2 + $0x8] sm:$0xff] %vm150_vm3, %v1555_v8 }
 0x5ea   :  { %1560 = vst.msk [vmem:[#allocation2 + $0x10] sm:$0xff] %vm150_vm3, %v1556_v45 }
 0x5eb   :  { %1561 = vst.msk [vmem:[#allocation2 + $0x18] sm:$0xff] %vm150_vm3, %v1557_v56 }
 0x5ec   :  { %1873 = shalt.err (!%p1870_p4)
}
 0x5ed   :  { %s1874_s4 = scalar_lea.hbm %s2284_s16, 512 }
 0x5ee   :  { %p1875_p5 = scmp.ne.s32.totalorder %s2284_s16, %s1874_s4  ;;  %p1878_p6 = scmp.lt.u32.totalorder %s1874_s4, %s2284_s16 }
 0x5f0   :  { %p1880_p7 = pnand %p1878_p6, %p1875_p5 }
 0x5f2   :  { %1883 = shalt.err (!%p1880_p7)
}
 0x5f3   :  { %s1891_s2 = smov 128   ;;  %s1892_s3 = smov 8  }
 0x5f4   :  { %1573 = dma.vmem_to_hbm [thread:$0]  %s1568_s27, 512, %s2284_s16, [#allocation3], %s1891_s2, %s1891_s2, %s1892_s3  }
 0x5f5   :  { %1884 = dma.done.wait [#allocation3], 512  }
 0x5f6   :  { %1885 = vsyncadd [#allocation3], 4294966784 }
 0x5f7   :  { %1577 = vsyncpa [#allocation3], 1 }

</bundles_post_ra>
